<compile_context>
chip_gen: v5e
topology: v5e:2x2
jax: 0.10.0
libtpu: 0.0.40
codegen_flags: <defaults>
</compile_context>

<pallas_src>
import jax
import jax.numpy as jnp
from jax.experimental import pallas as pl
from jax.experimental.pallas import tpu as pltpu

LANE = 128      # vreg lane width
SUBLANE = 8     # vreg sublane count (f32)


def _round_up(v, m):
    return (v + m - 1) // m * m


# ----------------------------- Pallas kernel ----------------------------------

def _make_fused_gnn_kernel(f_in_p, hid_p, out_p):
    """Build the fused kernel with static (padded) dims baked in for slab slicing."""
    w1_off = 0
    w2_off = f_in_p
    w3_off = f_in_p + hid_p
    wfc_off = f_in_p + 2 * hid_p

    def kernel(a_ref, p_ref, x_ref, w_ref, b_ref, o_ref):
        # A_hat loaded once (bf16), reused by all three GCN layers.
        a = a_ref[...]

        def gcn(h_bf16, w_off, w_rows, b_row, apply_act):
            w = w_ref[w_off:w_off + w_rows, :hid_p]                 # bf16 (static slice)
            b = b_ref[b_row:b_row + 1, :hid_p]                      # f32  (1, hid_p)
            # (N, Fin) @ (Fin, Fout) then (N, N) @ (N, Fout): bf16 MXU, f32 accumulate
            xw = jnp.dot(h_bf16, w, preferred_element_type=jnp.float32)
            out = jnp.dot(a, xw.astype(jnp.bfloat16),
                          preferred_element_type=jnp.float32) + b
            if apply_act:
                # F.leaky_relu default negative_slope = 0.01 (f32 on the VPU)
                out = jnp.where(out >= 0.0, out, 0.01 * out)
            return out

        h = gcn(x_ref[...], w1_off, f_in_p, 0, apply_act=True)
        # F.dropout(p=0.5) is identity in eval mode (training=False)
        h = gcn(h.astype(jnp.bfloat16), w2_off, hid_p, 1, apply_act=True)
        h = gcn(h.astype(jnp.bfloat16), w3_off, hid_p, 2, apply_act=False)

        # global_mean_pool as a matmul: (G, N) @ (N, H) -> (G, H)
        pooled = jnp.dot(p_ref[...], h.astype(jnp.bfloat16),
                         preferred_element_type=jnp.float32)
        # Linear + sigmoid: (G, H) @ (H, O) + b
        wfc = w_ref[wfc_off:wfc_off + hid_p, :out_p]
        logits = jnp.dot(pooled.astype(jnp.bfloat16), wfc,
                         preferred_element_type=jnp.float32) + b_ref[3:4, :out_p]
        o_ref[...] = jax.nn.sigmoid(logits).astype(o_ref.dtype)

    return kernel


# ------------------------------- Wrapper ---------------------------------------

@jax.jit
def spectral_gnn_forward(params, x, a_hat, pool_mat):
    n, f_in = x.shape
    g = pool_mat.shape[0]
    hidden = params["w1"].shape[1]
    out_dim = params["w_fc"].shape[1]

    # N is both a row (sublane) dim and the lane/contraction dim of A_hat / pool_mat,
    # so pad it to a multiple of 128. Graph rows pad to 16 (bf16 sublane pairs).
    n_p = _round_up(n, LANE)
    g_p = _round_up(g, 2 * SUBLANE)
    f_in_p = _round_up(f_in, LANE)
    hid_p = _round_up(hidden, LANE)
    out_p = _round_up(out_dim, LANE)
    w_cols = max(hid_p, out_p)

    def pad2(m, rows, cols, dtype):
        return jnp.pad(m, ((0, rows - m.shape[0]), (0, cols - m.shape[1]))).astype(dtype)

    # bf16 MXU operands; zero padding keeps the math exact.
    a_p = pad2(a_hat, n_p, n_p, jnp.bfloat16)
    p_p = pad2(pool_mat, g_p, n_p, jnp.bfloat16)
    x_p = pad2(x, n_p, f_in_p, jnp.bfloat16)

    # One bf16 weight slab (rows: w1 | w2 | w3 | w_fc), sliced with static offsets
    # in-kernel -> fewer prologue DMAs at these launch-latency-bound sizes.
    w_slab = jnp.concatenate([
        pad2(params["w1"], f_in_p, w_cols, jnp.bfloat16),
        pad2(params["w2"], hid_p, w_cols, jnp.bfloat16),
        pad2(params["w3"], hid_p, w_cols, jnp.bfloat16),
        pad2(params["w_fc"], hid_p, w_cols, jnp.bfloat16),
    ], axis=0)
    # One f32 bias slab (rows 0..3 = b1, b2, b3, b_fc); biases + all element-wise work
    # stay f32 (v5e has no bf16 VPU/EUP datapath; accumulators are f32 anyway).
    b_slab = jnp.zeros((SUBLANE, w_cols), jnp.float32)
    b_slab = b_slab.at[0, :hidden].set(params["b1"])
    b_slab = b_slab.at[1, :hidden].set(params["b2"])
    b_slab = b_slab.at[2, :hidden].set(params["b3"])
    b_slab = b_slab.at[3, :out_dim].set(params["b_fc"])

    # Advisory cost estimate so XLA can overlap the graph-prep glue with the kernel.
    flops = (
        2 * (n_p * f_in_p * hid_p + n_p * n_p * hid_p)          # layer 1
        + 2 * 2 * (n_p * hid_p * hid_p + n_p * n_p * hid_p)     # layers 2, 3
        + 2 * (g_p * n_p * hid_p + g_p * hid_p * out_p)         # pool + fc
    )
    bytes_accessed = (
        2 * (a_p.size + p_p.size + x_p.size + w_slab.size)      # bf16 inputs
        + 4 * (b_slab.size + g_p * out_p)                       # f32 bias + output
    )

    # Explicit scoped-VMEM budget: resident operands + f32 intermediates + slack,
    # capped at 64 MiB so the same value is legal on v7x (and >= v5e/v6e defaults
    # is unnecessary at these sizes anyway).
    resident_bytes = 2 * (a_p.size + p_p.size + x_p.size + w_slab.size) + 4 * b_slab.size
    interm_bytes = 6 * n_p * hid_p * 4 + g_p * out_p * 4
    vmem_limit = int(min(64 << 20, 2 * (resident_bytes + interm_bytes) + (8 << 20)))

    vmem = pl.BlockSpec(memory_space=pltpu.MemorySpace.VMEM)
    out = pl.pallas_call(
        _make_fused_gnn_kernel(f_in_p, hid_p, out_p),
        out_shape=jax.ShapeDtypeStruct((g_p, out_p), jnp.float32),
        in_specs=[vmem] * 5,
        out_specs=vmem,
        compiler_params=pltpu.CompilerParams(vmem_limit_bytes=vmem_limit),
        cost_estimate=pl.CostEstimate(
            flops=flops,
            transcendentals=g_p * out_p,
            bytes_accessed=bytes_accessed,
        ),
    )(a_p, p_p, x_p, w_slab, b_slab)

    # Drop padded graph rows / output columns (padding produces values that are never
    # contaminated by, nor contaminate, the real rows -- see zero-padding argument).
    return out[:g, :out_dim]


# ----------------------------- Plain-JAX glue ---------------------------------

def build_norm_adj(edge_index, edge_weight, num_nodes):
    """GCN normalization (PyG gcn_norm): add self-loops (w=1), A_hat = D^-1/2 (A+I) D^-1/2.
    A_hat[dst, src] = deg^-1/2[src] * w * deg^-1/2[dst]."""
    src = jnp.concatenate([edge_index[0], jnp.arange(num_nodes)])
    dst = jnp.concatenate([edge_index[1], jnp.arange(num_nodes)])
    w = jnp.concatenate([edge_weight, jnp.ones((num_nodes,), jnp.float32)])
    deg = jnp.zeros((num_nodes,), jnp.float32).at[dst].add(w)
    dis = jnp.where(deg > 0.0, jax.lax.rsqrt(deg), 0.0)
    norm = dis[src] * w * dis[dst]
    a_hat = jnp.zeros((num_nodes, num_nodes), jnp.float32).at[dst, src].add(norm)
    return a_hat


def build_pool_matrix(batch, num_graphs, num_nodes):
    """Mean-pool matrix P (G, N): P[g, n] = 1/|graph g| if batch[n] == g else 0."""
    one_hot = (batch[None, :] == jnp.arange(num_graphs)[:, None]).astype(jnp.float32)
    counts = jnp.maximum(one_hot.sum(axis=1, keepdims=True), 1.0)
    return one_hot / counts


def reference_forward(params, x, a_hat, pool_mat):
    def leaky(v):
        return jnp.where(v >= 0, v, 0.01 * v)
    h = leaky(a_hat @ (x @ params["w1"]) + params["b1"])
    h = leaky(a_hat @ (h @ params["w2"]) + params["b2"])
    h = a_hat @ (h @ params["w3"]) + params["b3"]
    return jax.nn.sigmoid(pool_mat @ h @ params["w_fc"] + params["b_fc"])


# --------------------------------- Main ---------------------------------------

if __name__ == "__main__":
    key = jax.random.PRNGKey(0)
    ks = jax.random.split(key, 12)

    # Small shapes consistent with the module
    num_nodes = 16        # total nodes across the batch
    num_graphs = 2        # 8 nodes per graph
    input_dim = 8
    hidden_dim = 32
    output_dim = 4

    # Node features
    x = jax.random.normal(ks[0], (num_nodes, input_dim), jnp.float32)

    # Edges: bidirectional ring within each graph (8 nodes per graph) -> 32 edges total
    per = num_nodes // num_graphs
    src_list, dst_list = [], []
    for gi in range(num_graphs):
        base = gi * per
        for i in range(per):
            a = base + i
            b = base + (i + 1) % per
            src_list += [a, b]
            dst_list += [b, a]
    edge_index = jnp.array([src_list, dst_list], dtype=jnp.int32)
    edge_weight = jax.random.uniform(ks[1], (edge_index.shape[1],), jnp.float32,
                                     minval=0.5, maxval=1.5)
    batch = jnp.repeat(jnp.arange(num_graphs, dtype=jnp.int32), per)

    # Deterministic parameter init (synthetic; not a checkpoint load)
    def lin_init(k, fan_in, fan_out):
        scale = 1.0 / jnp.sqrt(jnp.float32(fan_in))
        return jax.random.uniform(k, (fan_in, fan_out), jnp.float32, -scale, scale)

    params = {
        "w1": lin_init(ks[2], input_dim, hidden_dim),
        "b1": jax.random.uniform(ks[3], (hidden_dim,), jnp.float32, -0.1, 0.1),
        "w2": lin_init(ks[4], hidden_dim, hidden_dim),
        "b2": jax.random.uniform(ks[5], (hidden_dim,), jnp.float32, -0.1, 0.1),
        "w3": lin_init(ks[6], hidden_dim, hidden_dim),
        "b3": jax.random.uniform(ks[7], (hidden_dim,), jnp.float32, -0.1, 0.1),
        "w_fc": lin_init(ks[8], hidden_dim, output_dim),
        "b_fc": jax.random.uniform(ks[9], (output_dim,), jnp.float32, -0.1, 0.1),
    }

    a_hat = build_norm_adj(edge_index, edge_weight, num_nodes)
    pool_mat = build_pool_matrix(batch, num_graphs, num_nodes)

    out = spectral_gnn_forward(params, x, a_hat, pool_mat)
    out = jax.block_until_ready(out)

    # Tolerance loosened vs. the f32 reference because MXU operands are bf16
    # (f32 accumulate); outputs are sigmoid-bounded so this is a meaningful check.
    ref = reference_forward(params, x, a_hat, pool_mat)
    assert out.shape == (num_graphs, output_dim)
    assert jnp.allclose(out, ref, atol=2e-2, rtol=2e-2)

    print("KERNEL_OK")
</pallas_src>

<mosaic_0001>
module attributes {stable_mosaic.version = 11 : i64} {
  func.func @kernel(%arg0: memref<128x128xbf16, #tpu.memory_space<vmem>>, %arg1: memref<16x128xbf16, #tpu.memory_space<vmem>>, %arg2: memref<128x128xbf16, #tpu.memory_space<vmem>>, %arg3: memref<512x128xbf16, #tpu.memory_space<vmem>>, %arg4: memref<8x128xf32, #tpu.memory_space<vmem>>, %arg5: memref<16x128xf32, #tpu.memory_space<vmem>>) attributes {dimension_semantics = [], scalar_prefetch = 0 : i64, scratch_operands = 0 : i64, tpu.core_type = #tpu.core_type<tc>} {
    %c0 = arith.constant 0 : index
    %c0_0 = arith.constant 0 : index
    %0 = vector.load %arg0[%c0, %c0_0] : memref<128x128xbf16, #tpu.memory_space<vmem>>, vector<128x128xbf16>
    %c0_1 = arith.constant 0 : index
    %c0_2 = arith.constant 0 : index
    %1 = vector.load %arg2[%c0_1, %c0_2] : memref<128x128xbf16, #tpu.memory_space<vmem>>, vector<128x128xbf16>
    %c0_3 = arith.constant 0 : index
    %c0_4 = arith.constant 0 : index
    %2 = vector.load %arg3[%c0_3, %c0_4] : memref<512x128xbf16, #tpu.memory_space<vmem>>, vector<128x128xbf16>
    %c0_5 = arith.constant 0 : index
    %c0_6 = arith.constant 0 : index
    %3 = vector.load %arg4[%c0_5, %c0_6] : memref<8x128xf32, #tpu.memory_space<vmem>>, vector<1x128xf32>
    %cst = arith.constant dense<0.000000e+00> : vector<128x128xf32>
    %4 = tpu.matmul %1, %2, %cst {dimension_numbers = #tpu.dot_dimension_numbers<[1], [0], [0], [1], [0, 0, 1, 1], [], []>} : vector<128x128xbf16>, vector<128x128xbf16>, vector<128x128xf32> -> vector<128x128xf32>
    %5 = arith.truncf %4 : vector<128x128xf32> to vector<128x128xbf16>
    %cst_7 = arith.constant dense<0.000000e+00> : vector<128x128xf32>
    %6 = tpu.matmul %0, %5, %cst_7 {dimension_numbers = #tpu.dot_dimension_numbers<[1], [0], [0], [1], [0, 0, 1, 1], [], []>} : vector<128x128xbf16>, vector<128x128xbf16>, vector<128x128xf32> -> vector<128x128xf32>
    %7 = vector.broadcast %3 : vector<1x128xf32> to vector<128x128xf32>
    %8 = arith.addf %6, %7 : vector<128x128xf32>
    %cst_8 = arith.constant 0.000000e+00 : f32
    %9 = vector.broadcast %cst_8 : f32 to vector<128x128xf32>
    %10 = arith.cmpf oge, %8, %9 : vector<128x128xf32>
    %cst_9 = arith.constant 0.00999999977 : f32
    %11 = vector.broadcast %cst_9 : f32 to vector<128x128xf32>
    %12 = arith.mulf %11, %8 : vector<128x128xf32>
    %13 = arith.select %10, %8, %12 : vector<128x128xi1>, vector<128x128xf32>
    %14 = arith.truncf %13 : vector<128x128xf32> to vector<128x128xbf16>
    %c128 = arith.constant 128 : index
    %c0_10 = arith.constant 0 : index
    %15 = vector.load %arg3[%c128, %c0_10] : memref<512x128xbf16, #tpu.memory_space<vmem>>, vector<128x128xbf16>
    %c1 = arith.constant 1 : index
    %c0_11 = arith.constant 0 : index
    %16 = vector.load %arg4[%c1, %c0_11] : memref<8x128xf32, #tpu.memory_space<vmem>>, vector<1x128xf32>
    %cst_12 = arith.constant dense<0.000000e+00> : vector<128x128xf32>
    %17 = tpu.matmul %14, %15, %cst_12 {dimension_numbers = #tpu.dot_dimension_numbers<[1], [0], [0], [1], [0, 0, 1, 1], [], []>} : vector<128x128xbf16>, vector<128x128xbf16>, vector<128x128xf32> -> vector<128x128xf32>
    %18 = arith.truncf %17 : vector<128x128xf32> to vector<128x128xbf16>
    %cst_13 = arith.constant dense<0.000000e+00> : vector<128x128xf32>
    %19 = tpu.matmul %0, %18, %cst_13 {dimension_numbers = #tpu.dot_dimension_numbers<[1], [0], [0], [1], [0, 0, 1, 1], [], []>} : vector<128x128xbf16>, vector<128x128xbf16>, vector<128x128xf32> -> vector<128x128xf32>
    %20 = vector.broadcast %16 : vector<1x128xf32> to vector<128x128xf32>
    %21 = arith.addf %19, %20 : vector<128x128xf32>
    %cst_14 = arith.constant 0.000000e+00 : f32
    %22 = vector.broadcast %cst_14 : f32 to vector<128x128xf32>
    %23 = arith.cmpf oge, %21, %22 : vector<128x128xf32>
    %cst_15 = arith.constant 0.00999999977 : f32
    %24 = vector.broadcast %cst_15 : f32 to vector<128x128xf32>
    %25 = arith.mulf %24, %21 : vector<128x128xf32>
    %26 = arith.select %23, %21, %25 : vector<128x128xi1>, vector<128x128xf32>
    %27 = arith.truncf %26 : vector<128x128xf32> to vector<128x128xbf16>
    %c256 = arith.constant 256 : index
    %c0_16 = arith.constant 0 : index
    %28 = vector.load %arg3[%c256, %c0_16] : memref<512x128xbf16, #tpu.memory_space<vmem>>, vector<128x128xbf16>
    %c2 = arith.constant 2 : index
    %c0_17 = arith.constant 0 : index
    %29 = vector.load %arg4[%c2, %c0_17] : memref<8x128xf32, #tpu.memory_space<vmem>>, vector<1x128xf32>
    %cst_18 = arith.constant dense<0.000000e+00> : vector<128x128xf32>
    %30 = tpu.matmul %27, %28, %cst_18 {dimension_numbers = #tpu.dot_dimension_numbers<[1], [0], [0], [1], [0, 0, 1, 1], [], []>} : vector<128x128xbf16>, vector<128x128xbf16>, vector<128x128xf32> -> vector<128x128xf32>
    %31 = arith.truncf %30 : vector<128x128xf32> to vector<128x128xbf16>
    %cst_19 = arith.constant dense<0.000000e+00> : vector<128x128xf32>
    %32 = tpu.matmul %0, %31, %cst_19 {dimension_numbers = #tpu.dot_dimension_numbers<[1], [0], [0], [1], [0, 0, 1, 1], [], []>} : vector<128x128xbf16>, vector<128x128xbf16>, vector<128x128xf32> -> vector<128x128xf32>
    %33 = vector.broadcast %29 : vector<1x128xf32> to vector<128x128xf32>
    %34 = arith.addf %32, %33 : vector<128x128xf32>
    %c0_20 = arith.constant 0 : index
    %c0_21 = arith.constant 0 : index
    %35 = vector.load %arg1[%c0_20, %c0_21] : memref<16x128xbf16, #tpu.memory_space<vmem>>, vector<16x128xbf16>
    %36 = arith.truncf %34 : vector<128x128xf32> to vector<128x128xbf16>
    %cst_22 = arith.constant dense<0.000000e+00> : vector<16x128xf32>
    %37 = tpu.matmul %35, %36, %cst_22 {dimension_numbers = #tpu.dot_dimension_numbers<[1], [0], [0], [1], [0, 0, 1, 1], [], []>} : vector<16x128xbf16>, vector<128x128xbf16>, vector<16x128xf32> -> vector<16x128xf32>
    %c384 = arith.constant 384 : index
    %c0_23 = arith.constant 0 : index
    %38 = vector.load %arg3[%c384, %c0_23] : memref<512x128xbf16, #tpu.memory_space<vmem>>, vector<128x128xbf16>
    %39 = arith.truncf %37 : vector<16x128xf32> to vector<16x128xbf16>
    %cst_24 = arith.constant dense<0.000000e+00> : vector<16x128xf32>
    %40 = tpu.matmul %39, %38, %cst_24 {dimension_numbers = #tpu.dot_dimension_numbers<[1], [0], [0], [1], [0, 0, 1, 1], [], []>} : vector<16x128xbf16>, vector<128x128xbf16>, vector<16x128xf32> -> vector<16x128xf32>
    %c3 = arith.constant 3 : index
    %c0_25 = arith.constant 0 : index
    %41 = vector.load %arg4[%c3, %c0_25] : memref<8x128xf32, #tpu.memory_space<vmem>>, vector<1x128xf32>
    %42 = vector.broadcast %41 : vector<1x128xf32> to vector<16x128xf32>
    %43 = arith.addf %40, %42 : vector<16x128xf32>
    %44 = arith.negf %43 : vector<16x128xf32>
    %45 = math.exp %44 : vector<16x128xf32>
    %cst_26 = arith.constant 1.000000e+00 : f32
    %46 = vector.broadcast %cst_26 : f32 to vector<16x128xf32>
    %47 = arith.addf %46, %45 : vector<16x128xf32>
    %48 = arith.divf %46, %47 : vector<16x128xf32>
    %c0_27 = arith.constant 0 : index
    %c0_28 = arith.constant 0 : index
    %49 = vector.load %arg5[%c0_27, %c0_28] : memref<16x128xf32, #tpu.memory_space<vmem>>, vector<16x128xf32>
    tpu.vector_store %arg5[%c0_27, %c0_28], %48 {strides = array<i32>} : memref<16x128xf32, #tpu.memory_space<vmem>>, vector<16x128xf32>,
    return
  }
}

</mosaic_0001>

<bundles_post_ra>
// kernel: spectral_gnn_forward.1
= control target key start
LH: loop header
LB: loop body
LE: loop exit
PB: predicated region body
PF: predicated region fallthrough
CT: control target
= control target key end

     0   :  { %s1477_s3 = inlined_call_operand.vmem [shape: bf16[512,128], index: 3, kind: input, shape index: {}]   ;;  %s1478_s2 = inlined_call_operand.vmem [shape: bf16[128,128], index: 2, kind: input, shape index: {}]   ;;  %s1479_s4 = inlined_call_operand.vmem [shape: f32[8,128], index: 4, kind: input, shape index: {}]   ;;  %s1480_s0 = inlined_call_operand.vmem [shape: bf16[128,128], index: 0, kind: input, shape index: {}]   ;;  %s1481_s1 = inlined_call_operand.vmem [shape: bf16[16,128], index: 1, kind: input, shape index: {}]   ;;  %s1482_s5 = inlined_call_operand.vmem [shape: f32[16,128], index: 5, kind: output, shape index: {}]  }
   0x1   :  { %v1152_v0 = vld [vmem:[%s1477_s3 + $0x38] sm:$0xff]  ;;  %v1151_v1 = vld [vmem:[%s1477_s3 + $0x30] sm:$0xff]  ;;  %v1150_v2 = vld [vmem:[%s1477_s3 + $0x28] sm:$0xff] }
   0x2   :  { %165 = vmatpush.bf16.msra.mxu0 %v1152_v0  ;;  %1178 = vmatpush.bf16.msra.mxu2 %v1152_v0  ;;  %v1149_v3 = vld [vmem:[%s1477_s3 + $0x20] sm:$0xff]  ;;  %v1148_v4 = vld [vmem:[%s1477_s3 + $0x18] sm:$0xff]  ;;  %v1147_v5 = vld [vmem:[%s1477_s3 + $0x10] sm:$0xff] }
   0x3   :  { %v1146_v6 = vld [vmem:[%s1477_s3 + $0x8] sm:$0xff]  ;;  %v1145_v7 = vld [vmem:[%s1477_s3] sm:$0xff]  ;;  %v1143_v11 = vld [vmem:[%s1478_s2 + $0x30] sm:$0xff] }
   0x4   :  { %v1137_v8 = vld [vmem:[%s1478_s2] sm:$0xff]  ;;  %v1142_v9 = vld [vmem:[%s1478_s2 + $0x28] sm:$0xff]  ;;  %v1139_v12 = vld [vmem:[%s1478_s2 + $0x10] sm:$0xff] }
   0x5   :  { %v1138_v10 = vld [vmem:[%s1478_s2 + $0x8] sm:$0xff]  ;;  %v1144_v13 = vld [vmem:[%s1478_s2 + $0x38] sm:$0xff]  ;;  %v1141_v15 = vld [vmem:[%s1478_s2 + $0x20] sm:$0xff] }
   0x6   :  { %166 = vmatpush.bf16.msra.mxu0 %v1151_v1  ;;  %1179 = vmatpush.bf16.msra.mxu2 %v1151_v1  ;;  %v1140_v14 = vld [vmem:[%s1478_s2 + $0x18] sm:$0xff]  ;;  %v1287_v40 = vld [vmem:[%s1480_s0] sm:$0xff]  ;;  %v1293_v41 = vld [vmem:[%s1480_s0 + $0x8] sm:$0xff] }
   0x7   :  { %v1299_v42 = vld [vmem:[%s1480_s0 + $0x10] sm:$0xff]  ;;  %v1304_v43 = vld [vmem:[%s1480_s0 + $0x28] sm:$0xff]  ;;  %v1160_v44 = vld [vmem:[%s1477_s3 + $0x78] sm:$0xff] }
   0x8   :  { %v1159_v45 = vld [vmem:[%s1477_s3 + $0x70] sm:$0xff]  ;;  %v1158_v46 = vld [vmem:[%s1477_s3 + $0x68] sm:$0xff]  ;;  %v1157_v47 = vld [vmem:[%s1477_s3 + $0x60] sm:$0xff] }
   0x9   :  { %v1323_v48 = vld [vmem:[%s1480_s0 + $0x18] sm:$0xff]  ;;  %v1328_v49 = vld [vmem:[%s1480_s0 + $0x30] sm:$0xff]  ;;  %v1335_v50 = vld [vmem:[%s1480_s0 + $0x20] sm:$0xff] }
   0xa   :  { %167 = vmatpush.bf16.msra.mxu0 %v1150_v2  ;;  %1180 = vmatpush.bf16.msra.mxu2 %v1150_v2  ;;  %v1340_v51 = vld [vmem:[%s1480_s0 + $0x38] sm:$0xff]  ;;  %v1155_v53 = vld [vmem:[%s1477_s3 + $0x50] sm:$0xff]  ;;  %v1154_v54 = vld [vmem:[%s1477_s3 + $0x48] sm:$0xff] }
   0xb   :  { %v1156_v52 = vld [vmem:[%s1477_s3 + $0x58] sm:$0xff]  ;;  %v1153_v55 = vld [vmem:[%s1477_s3 + $0x40] sm:$0xff] }
   0xc   :  { %v1359_v57 = vld [vmem:[%s1479_s4] ss:$0 sm:$0xff] }
   0xe   :  { %168 = vmatpush.bf16.msra.mxu0 %v1149_v3  ;;  %1181 = vmatpush.bf16.msra.mxu2 %v1149_v3 }
  0x12   :  { %169 = vmatpush.bf16.msra.mxu0 %v1148_v4  ;;  %1182 = vmatpush.bf16.msra.mxu2 %v1148_v4 }
  0x16   :  { %170 = vmatpush.bf16.msra.mxu0 %v1147_v5  ;;  %1183 = vmatpush.bf16.msra.mxu2 %v1147_v5 }
  0x1a   :  { %171 = vmatpush.bf16.msra.mxu0 %v1146_v6  ;;  %1184 = vmatpush.bf16.msra.mxu2 %v1146_v6 }
  0x1e   :  { %172 = vmatpush.bf16.msra.mxu0 %v1145_v7  ;;  %1185 = vmatpush.bf16.msra.mxu2 %v1145_v7 }
  0x21   :  { %173 = vmatmul.bf16.vlgmr.msra.gmra.mxu0 %v1137_v8  ;;  %198 = vmatmul.bf16.vlgmr.msra.gmra.mxu2 %v1142_v9 }
  0x22   :  { %441 = vmatpush.bf16.msrb.mxu2 %v1160_v44 }
  0x26   :  { %442 = vmatpush.bf16.msrb.mxu2 %v1159_v45 }
  0x2a   :  { %443 = vmatpush.bf16.msrb.mxu2 %v1158_v46 }
  0x2e   :  { %444 = vmatpush.bf16.msrb.mxu2 %v1157_v47 }
  0x31   :  { %178 = vmatmul.bf16.gmra.mxu0 %v1138_v10  ;;  %203 = vmatmul.bf16.gmra.mxu2 %v1143_v11 }
  0x32   :  { %445 = vmatpush.bf16.msrb.mxu2 %v1156_v52 }
  0x36   :  { %446 = vmatpush.bf16.msrb.mxu2 %v1155_v53 }
  0x3a   :  { %447 = vmatpush.bf16.msrb.mxu2 %v1154_v54 }
  0x3e   :  { %448 = vmatpush.bf16.msrb.mxu2 %v1153_v55 }
  0x41   :  { %183 = vmatmul.bf16.gmra.mxu0 %v1139_v12  ;;  %208 = vmatmul.bf16.gmra.mxu2 %v1144_v13 }
  0x51   :  { %188 = vmatmul.bf16.gmra.mxu0 %v1140_v14 }
  0x61   :  { %193 = vmatmul.bf16.gmra.mxu0 %v1141_v15 }
  0x9e   :  { %v174_v16 = vpop.f32.mrf.mxu0 }
  0xa4   :  { %v199_v17 = vpop.f32.mrf.mxu2 }
  0xa6   :  { %v176_v18 = vpop.f32.mrf.mxu0 }
  0xa7   :  { %v214_v39 = vpack.c.bf16 %v176_v18, %v174_v16 }
  0xac   :  { %v201_v19 = vpop.f32.mrf.mxu2 }
  0xad   :  { %v219_v31 = vpack.c.bf16 %v201_v19, %v199_v17 }
  0xae   :  { %v179_v20 = vpop.f32.mrf.mxu0 }
  0xb4   :  { %v204_v21 = vpop.f32.mrf.mxu2 }
  0xb6   :  { %v181_v22 = vpop.f32.mrf.mxu0 }
  0xb7   :  { %v215_v38 = vpack.c.bf16 %v181_v22, %v179_v20 }
  0xbc   :  { %v206_v23 = vpop.f32.mrf.mxu2 }
  0xbd   :  { %v220_v30 = vpack.c.bf16 %v206_v23, %v204_v21 }
  0xbe   :  { %v184_v24 = vpop.f32.mrf.mxu0 }
  0xc4   :  { %v209_v25 = vpop.f32.mrf.mxu2 }
  0xc6   :  { %v186_v26 = vpop.f32.mrf.mxu0 }
  0xc7   :  { %v216_v37 = vpack.c.bf16 %v186_v26, %v184_v24 }
  0xcc   :  { %v211_v27 = vpop.f32.mrf.mxu2 }
  0xcd   :  { %v221_v28 = vpack.c.bf16 %v211_v27, %v209_v25 }
  0xce   :  { %v189_v29 = vpop.f32.mrf.mxu0 }
  0xcf   :  { %271 = vmatpush.bf16.msra.mxu1 %v221_v28  ;;  %1186 = vmatpush.bf16.msra.mxu3 %v221_v28 }
  0xd3   :  { %272 = vmatpush.bf16.msra.mxu1 %v220_v30  ;;  %1187 = vmatpush.bf16.msra.mxu3 %v220_v30 }
  0xd6   :  { %v191_v32 = vpop.f32.mrf.mxu0 }
  0xd7   :  { %273 = vmatpush.bf16.msra.mxu1 %v219_v31  ;;  %1188 = vmatpush.bf16.msra.mxu3 %v219_v31  ;;  %v217_v36 = vpack.c.bf16 %v191_v32, %v189_v29 }
  0xde   :  { %v194_v33 = vpop.f32.mrf.mxu0 }
  0xe6   :  { %v196_v34 = vpop.f32.mrf.mxu0 }
  0xe7   :  { %v218_v35 = vpack.c.bf16 %v196_v34, %v194_v33 }
  0xe9   :  { %274 = vmatpush.bf16.msra.mxu1 %v218_v35  ;;  %1189 = vmatpush.bf16.msra.mxu3 %v218_v35 }
  0xed   :  { %275 = vmatpush.bf16.msra.mxu1 %v217_v36  ;;  %1190 = vmatpush.bf16.msra.mxu3 %v217_v36 }
  0xf1   :  { %276 = vmatpush.bf16.msra.mxu1 %v216_v37  ;;  %1191 = vmatpush.bf16.msra.mxu3 %v216_v37 }
  0xf5   :  { %277 = vmatpush.bf16.msra.mxu1 %v215_v38  ;;  %1192 = vmatpush.bf16.msra.mxu3 %v215_v38 }
  0xf9   :  { %278 = vmatpush.bf16.msra.mxu1 %v214_v39  ;;  %1193 = vmatpush.bf16.msra.mxu3 %v214_v39 }
  0xfc   :  { %279 = vmatmul.bf16.vlgmr.msra.gmra.mxu1 %v1287_v40  ;;  %304 = vmatmul.bf16.vlgmr.msra.gmra.mxu3 %v1304_v43 }
 0x10c   :  { %284 = vmatmul.bf16.gmra.mxu1 %v1293_v41  ;;  %309 = vmatmul.bf16.gmra.mxu3 %v1328_v49 }
 0x11c   :  { %289 = vmatmul.bf16.gmra.mxu1 %v1299_v42  ;;  %314 = vmatmul.bf16.gmra.mxu3 %v1340_v51 }
 0x12c   :  { %294 = vmatmul.bf16.gmra.mxu1 %v1323_v48 }
 0x13c   :  { %299 = vmatmul.bf16.gmra.mxu1 %v1335_v50 }
 0x179   :  { %v280_v56 = vpop.f32.mrf.mxu1 }
 0x17a   :  { %v281_v58 = vadd.f32 %v1359_v57, %v280_v56 }
 0x17c   :  { %v336_v60 = vmul.f32 0.01, %v281_v58  ;;  %vm320_vm0 = vcmp.ge.f32.partialorder %v281_v58, 0.0 }
 0x17e   :  { %v352_v63 = vsel %vm320_vm0, %v281_v58, %v336_v60 }
 0x17f   :  { %v305_v29 = vpop.f32.mrf.mxu3 }
 0x180   :  { %v306_v45 = vadd.f32 %v1359_v57, %v305_v29 }
 0x181   :  { %v282_v59 = vpop.f32.mrf.mxu1 }
 0x182   :  { %v283_v61 = vadd.f32 %v1359_v57, %v282_v59  ;;  %v346_v47 = vmul.f32 0.01, %v306_v45  ;;  %vm330_vm10 = vcmp.ge.f32.partialorder %v306_v45, 0.0 }
 0x184   :  { %vm321_vm1 = vcmp.ge.f32.partialorder %v283_v61, 0.0  ;;  %v337_v62 = vmul.f32 0.01, %v283_v61  ;;  %v362_v53 = vsel %vm330_vm10, %v306_v45, %v346_v47 }
 0x186   :  { %v353_v0 = vsel %vm321_vm1, %v283_v61, %v337_v62 }
 0x187   :  { %v368_v1 = vpack.c.bf16 %v353_v0, %v352_v63  ;;  %v307_v33 = vpop.f32.mrf.mxu3 }
 0x188   :  { %v308_v46 = vadd.f32 %v1359_v57, %v307_v33  ;;  %v1168_v33 = vld [vmem:[%s1477_s3 + $0xb8] sm:$0xff] }
 0x189   :  { %v285_v2 = vpop.f32.mrf.mxu1  ;;  %449 = vmatmul.bf16.vlgmr.msrb.gmra.mxu2 %v368_v1  ;;  %669 = vmatpush.bf16.msrb.mxu0 %v1168_v33 }
 0x18a   :  { %v286_v3 = vadd.f32 %v1359_v57, %v285_v2  ;;  %v347_v52 = vmul.f32 0.01, %v308_v46  ;;  %vm331_vm11 = vcmp.ge.f32.partialorder %v308_v46, 0.0 }
 0x18c   :  { %v338_v5 = vmul.f32 0.01, %v286_v3  ;;  %vm322_vm2 = vcmp.ge.f32.partialorder %v286_v3, 0.0  ;;  %v363_v54 = vsel %vm331_vm11, %v308_v46, %v347_v52  ;;  %v1412_v46 = vld [vmem:[%s1479_s4 + $0x1] ss:$0 sm:$0xff] }
 0x18d   :  { %v373_v56 = vpack.c.bf16 %v363_v54, %v362_v53 }
 0x18e   :  { %v354_v8 = vsel %vm322_vm2, %v286_v3, %v338_v5 }
 0x18f   :  { %v310_v44 = vpop.f32.mrf.mxu3 }
 0x190   :  { %v311_v58 = vadd.f32 %v1359_v57, %v310_v44  ;;  %v1161_v44 = vld [vmem:[%s1477_s3 + $0x80] sm:$0xff] }
 0x191   :  { %v287_v4 = vpop.f32.mrf.mxu1 }
 0x192   :  { %v288_v6 = vadd.f32 %v1359_v57, %v287_v4  ;;  %v348_v61 = vmul.f32 0.01, %v311_v58  ;;  %vm332_vm12 = vcmp.ge.f32.partialorder %v311_v58, 0.0 }
 0x194   :  { %v339_v7 = vmul.f32 0.01, %v288_v6  ;;  %vm323_vm3 = vcmp.ge.f32.partialorder %v288_v6, 0.0  ;;  %v364_v63 = vsel %vm332_vm12, %v311_v58, %v348_v61 }
 0x196   :  { %v355_v9 = vsel %vm323_vm3, %v288_v6, %v339_v7 }
 0x197   :  { %v369_v10 = vpack.c.bf16 %v355_v9, %v354_v8  ;;  %v312_v55 = vpop.f32.mrf.mxu3 }
 0x198   :  { %v313_v59 = vadd.f32 %v1359_v57, %v312_v55 }
 0x199   :  { %v290_v11 = vpop.f32.mrf.mxu1  ;;  %454 = vmatmul.bf16.gmra.mxu2 %v369_v10 }
 0x19a   :  { %v291_v12 = vadd.f32 %v1359_v57, %v290_v11  ;;  %v349_v62 = vmul.f32 0.01, %v313_v59  ;;  %vm333_vm13 = vcmp.ge.f32.partialorder %v313_v59, 0.0 }
 0x19c   :  { %v340_v14 = vmul.f32 0.01, %v291_v12  ;;  %vm324_vm4 = vcmp.ge.f32.partialorder %v291_v12, 0.0  ;;  %v365_v0 = vsel %vm333_vm13, %v313_v59, %v349_v62 }
 0x19d   :  { %v374_v1 = vpack.c.bf16 %v365_v0, %v364_v63 }
 0x19e   :  { %v356_v17 = vsel %vm324_vm4, %v291_v12, %v340_v14 }
 0x19f   :  { %v315_v60 = vpop.f32.mrf.mxu3 }
 0x1a0   :  { %v316_v3 = vadd.f32 %v1359_v57, %v315_v60 }
 0x1a1   :  { %v292_v13 = vpop.f32.mrf.mxu1 }
 0x1a2   :  { %v293_v15 = vadd.f32 %v1359_v57, %v292_v13  ;;  %v350_v5 = vmul.f32 0.01, %v316_v3  ;;  %vm334_vm14 = vcmp.ge.f32.partialorder %v316_v3, 0.0 }
 0x1a4   :  { %v341_v16 = vmul.f32 0.01, %v293_v15  ;;  %vm325_vm5 = vcmp.ge.f32.partialorder %v293_v15, 0.0  ;;  %v366_v7 = vsel %vm334_vm14, %v316_v3, %v350_v5 }
 0x1a6   :  { %v357_v18 = vsel %vm325_vm5, %v293_v15, %v341_v16 }
 0x1a7   :  { %v370_v19 = vpack.c.bf16 %v357_v18, %v356_v17  ;;  %v317_v2 = vpop.f32.mrf.mxu3 }
 0x1a8   :  { %v318_v4 = vadd.f32 %v1359_v57, %v317_v2 }
 0x1a9   :  { %v295_v20 = vpop.f32.mrf.mxu1  ;;  %459 = vmatmul.bf16.gmra.mxu2 %v370_v19 }
 0x1aa   :  { %v296_v21 = vadd.f32 %v1359_v57, %v295_v20  ;;  %v351_v6 = vmul.f32 0.01, %v318_v4  ;;  %vm335_vm15 = vcmp.ge.f32.partialorder %v318_v4, 0.0 }
 0x1ac   :  { %v342_v23 = vmul.f32 0.01, %v296_v21  ;;  %vm326_vm6 = vcmp.ge.f32.partialorder %v296_v21, 0.0  ;;  %v367_v8 = vsel %vm335_vm15, %v318_v4, %v351_v6 }
 0x1ad   :  { %v375_v9 = vpack.c.bf16 %v367_v8, %v366_v7 }
 0x1ae   :  { %v358_v26 = vsel %vm326_vm6, %v296_v21, %v342_v23 }
 0x1b1   :  { %v297_v22 = vpop.f32.mrf.mxu1 }
 0x1b2   :  { %v298_v24 = vadd.f32 %v1359_v57, %v297_v22 }
 0x1b4   :  { %v343_v25 = vmul.f32 0.01, %v298_v24  ;;  %vm327_vm7 = vcmp.ge.f32.partialorder %v298_v24, 0.0 }
 0x1b6   :  { %v359_v27 = vsel %vm327_vm7, %v298_v24, %v343_v25 }
 0x1b7   :  { %v371_v28 = vpack.c.bf16 %v359_v27, %v358_v26 }
 0x1b9   :  { %v300_v30 = vpop.f32.mrf.mxu1  ;;  %464 = vmatmul.bf16.gmra.mxu2 %v371_v28 }
 0x1ba   :  { %v301_v31 = vadd.f32 %v1359_v57, %v300_v30 }
 0x1bc   :  { %v344_v34 = vmul.f32 0.01, %v301_v31  ;;  %vm328_vm8 = vcmp.ge.f32.partialorder %v301_v31, 0.0 }
 0x1be   :  { %v360_v37 = vsel %vm328_vm8, %v301_v31, %v344_v34  ;;  %v1167_v34 = vld [vmem:[%s1477_s3 + $0xb0] sm:$0xff] }
 0x1bf   :  { %670 = vmatpush.bf16.msrb.mxu0 %v1167_v34 }
 0x1c1   :  { %v302_v32 = vpop.f32.mrf.mxu1 }
 0x1c2   :  { %v303_v35 = vadd.f32 %v1359_v57, %v302_v32 }
 0x1c4   :  { %v345_v36 = vmul.f32 0.01, %v303_v35  ;;  %vm329_vm9 = vcmp.ge.f32.partialorder %v303_v35, 0.0 }
 0x1c6   :  { %v361_v38 = vsel %vm329_vm9, %v303_v35, %v345_v36  ;;  %v1166_v35 = vld [vmem:[%s1477_s3 + $0xa8] sm:$0xff]  ;;  %v1165_v36 = vld [vmem:[%s1477_s3 + $0xa0] sm:$0xff] }
 0x1c7   :  { %v372_v39 = vpack.c.bf16 %v361_v38, %v360_v37  ;;  %671 = vmatpush.bf16.msrb.mxu0 %v1166_v35  ;;  %v1164_v37 = vld [vmem:[%s1477_s3 + $0x98] sm:$0xff]  ;;  %v1163_v38 = vld [vmem:[%s1477_s3 + $0x90] sm:$0xff] }
 0x1c9   :  { %469 = vmatmul.bf16.gmra.mxu2 %v372_v39  ;;  %v1162_v39 = vld [vmem:[%s1477_s3 + $0x88] sm:$0xff] }
 0x1cb   :  { %672 = vmatpush.bf16.msrb.mxu0 %v1165_v36 }
 0x1cf   :  { %673 = vmatpush.bf16.msrb.mxu0 %v1164_v37 }
 0x1d3   :  { %674 = vmatpush.bf16.msrb.mxu0 %v1163_v38 }
 0x1d7   :  { %675 = vmatpush.bf16.msrb.mxu0 %v1162_v39 }
 0x1d9   :  { %474 = vmatmul.bf16.gmra.mxu2 %v373_v56 }
 0x1db   :  { %676 = vmatpush.bf16.msrb.mxu0 %v1161_v44 }
 0x1e9   :  { %479 = vmatmul.bf16.gmra.mxu2 %v374_v1 }
 0x1f9   :  { %484 = vmatmul.bf16.gmra.mxu2 %v375_v9 }
 0x20c   :  { %v450_v10 = vpop.f32.mrf.mxu2 }
 0x214   :  { %v452_v11 = vpop.f32.mrf.mxu2 }
 0x215   :  { %v490_v12 = vpack.c.bf16 %v452_v11, %v450_v10 }
 0x21c   :  { %v455_v13 = vpop.f32.mrf.mxu2 }
 0x224   :  { %v457_v14 = vpop.f32.mrf.mxu2 }
 0x225   :  { %v491_v15 = vpack.c.bf16 %v457_v14, %v455_v13 }
 0x22c   :  { %v460_v16 = vpop.f32.mrf.mxu2 }
 0x234   :  { %v462_v17 = vpop.f32.mrf.mxu2 }
 0x235   :  { %v492_v18 = vpack.c.bf16 %v462_v17, %v460_v16 }
 0x23c   :  { %v465_v19 = vpop.f32.mrf.mxu2 }
 0x244   :  { %v467_v20 = vpop.f32.mrf.mxu2 }
 0x245   :  { %v493_v57 = vpack.c.bf16 %v467_v20, %v465_v19 }
 0x24c   :  { %v470_v21 = vpop.f32.mrf.mxu2 }
 0x254   :  { %v472_v22 = vpop.f32.mrf.mxu2 }
 0x255   :  { %v494_v32 = vpack.c.bf16 %v472_v22, %v470_v21 }
 0x25c   :  { %v475_v23 = vpop.f32.mrf.mxu2 }
 0x264   :  { %v477_v24 = vpop.f32.mrf.mxu2 }
 0x265   :  { %v495_v31 = vpack.c.bf16 %v477_v24, %v475_v23 }
 0x26c   :  { %v480_v25 = vpop.f32.mrf.mxu2 }
 0x274   :  { %v482_v26 = vpop.f32.mrf.mxu2 }
 0x275   :  { %v496_v30 = vpack.c.bf16 %v482_v26, %v480_v25 }
 0x27c   :  { %v485_v27 = vpop.f32.mrf.mxu2 }
 0x284   :  { %v487_v28 = vpop.f32.mrf.mxu2 }
 0x285   :  { %v497_v29 = vpack.c.bf16 %v487_v28, %v485_v27 }
 0x287   :  { %499 = vmatpush.bf16.msrb.mxu3 %v497_v29 }
 0x28b   :  { %500 = vmatpush.bf16.msrb.mxu3 %v496_v30 }
 0x28f   :  { %501 = vmatpush.bf16.msrb.mxu3 %v495_v31 }
 0x293   :  { %502 = vmatpush.bf16.msrb.mxu3 %v494_v32 }
 0x297   :  { %503 = vmatpush.bf16.msrb.mxu3 %v493_v57 }
 0x29b   :  { %504 = vmatpush.bf16.msrb.mxu3 %v492_v18 }
 0x29f   :  { %505 = vmatpush.bf16.msrb.mxu3 %v491_v15 }
 0x2a3   :  { %506 = vmatpush.bf16.msrb.mxu3 %v490_v12 }
 0x2a6   :  { %507 = vmatmul.bf16.vlgmr.msrb.gmra.mxu3 %v1287_v40 }
 0x2b6   :  { %512 = vmatmul.bf16.gmra.mxu3 %v1293_v41 }
 0x2c6   :  { %517 = vmatmul.bf16.gmra.mxu3 %v1299_v42 }
 0x2d6   :  { %522 = vmatmul.bf16.gmra.mxu3 %v1323_v48 }
 0x2e6   :  { %527 = vmatmul.bf16.gmra.mxu3 %v1335_v50 }
 0x2f6   :  { %532 = vmatmul.bf16.gmra.mxu3 %v1304_v43 }
 0x306   :  { %537 = vmatmul.bf16.gmra.mxu3 %v1328_v49 }
 0x316   :  { %542 = vmatmul.bf16.gmra.mxu3 %v1340_v51 }
 0x329   :  { %v508_v45 = vpop.f32.mrf.mxu3 }
 0x32a   :  { %v509_v47 = vadd.f32 %v1412_v46, %v508_v45 }
 0x32c   :  { %v564_v53 = vmul.f32 0.01, %v509_v47  ;;  %vm548_vm0 = vcmp.ge.f32.partialorder %v509_v47, 0.0 }
 0x32e   :  { %v580_v56 = vsel %vm548_vm0, %v509_v47, %v564_v53 }
 0x331   :  { %v510_v52 = vpop.f32.mrf.mxu3 }
 0x332   :  { %v511_v54 = vadd.f32 %v1412_v46, %v510_v52 }
 0x334   :  { %vm549_vm1 = vcmp.ge.f32.partialorder %v511_v54, 0.0  ;;  %v565_v55 = vmul.f32 0.01, %v511_v54 }
 0x336   :  { %v581_v58 = vsel %vm549_vm1, %v511_v54, %v565_v55 }
 0x337   :  { %v596_v59 = vpack.c.bf16 %v581_v58, %v580_v56 }
 0x339   :  { %v513_v60 = vpop.f32.mrf.mxu3  ;;  %677 = vmatmul.bf16.vlgmr.msrb.gmra.mxu0 %v596_v59 }
 0x33a   :  { %v514_v61 = vadd.f32 %v1412_v46, %v513_v60 }
 0x33c   :  { %v566_v63 = vmul.f32 0.01, %v514_v61  ;;  %vm550_vm2 = vcmp.ge.f32.partialorder %v514_v61, 0.0 }
 0x33e   :  { %v582_v2 = vsel %vm550_vm2, %v514_v61, %v566_v63 }
 0x341   :  { %v515_v62 = vpop.f32.mrf.mxu3 }
 0x342   :  { %v516_v0 = vadd.f32 %v1412_v46, %v515_v62 }
 0x344   :  { %v567_v1 = vmul.f32 0.01, %v516_v0  ;;  %vm551_vm3 = vcmp.ge.f32.partialorder %v516_v0, 0.0 }
 0x346   :  { %v583_v3 = vsel %vm551_vm3, %v516_v0, %v567_v1 }
 0x347   :  { %v597_v4 = vpack.c.bf16 %v583_v3, %v582_v2 }
 0x349   :  { %v518_v5 = vpop.f32.mrf.mxu3  ;;  %682 = vmatmul.bf16.gmra.mxu0 %v597_v4 }
 0x34a   :  { %v519_v6 = vadd.f32 %v1412_v46, %v518_v5 }
 0x34c   :  { %v568_v8 = vmul.f32 0.01, %v519_v6  ;;  %vm552_vm4 = vcmp.ge.f32.partialorder %v519_v6, 0.0 }
 0x34e   :  { %v584_v11 = vsel %vm552_vm4, %v519_v6, %v568_v8 }
 0x351   :  { %v520_v7 = vpop.f32.mrf.mxu3 }
 0x352   :  { %v521_v9 = vadd.f32 %v1412_v46, %v520_v7 }
 0x354   :  { %v569_v10 = vmul.f32 0.01, %v521_v9  ;;  %vm553_vm5 = vcmp.ge.f32.partialorder %v521_v9, 0.0 }
 0x356   :  { %v585_v12 = vsel %vm553_vm5, %v521_v9, %v569_v10 }
 0x357   :  { %v598_v13 = vpack.c.bf16 %v585_v12, %v584_v11 }
 0x359   :  { %v523_v14 = vpop.f32.mrf.mxu3  ;;  %687 = vmatmul.bf16.gmra.mxu0 %v598_v13 }
 0x35a   :  { %v524_v15 = vadd.f32 %v1412_v46, %v523_v14 }
 0x35c   :  { %v570_v17 = vmul.f32 0.01, %v524_v15  ;;  %vm554_vm6 = vcmp.ge.f32.partialorder %v524_v15, 0.0 }
 0x35e   :  { %v586_v20 = vsel %vm554_vm6, %v524_v15, %v570_v17 }
 0x361   :  { %v525_v16 = vpop.f32.mrf.mxu3 }
 0x362   :  { %v526_v18 = vadd.f32 %v1412_v46, %v525_v16 }
 0x364   :  { %v571_v19 = vmul.f32 0.01, %v526_v18  ;;  %vm555_vm7 = vcmp.ge.f32.partialorder %v526_v18, 0.0 }
 0x366   :  { %v587_v57 = vsel %vm555_vm7, %v526_v18, %v571_v19 }
 0x367   :  { %v599_v21 = vpack.c.bf16 %v587_v57, %v586_v20 }
 0x369   :  { %v528_v22 = vpop.f32.mrf.mxu3  ;;  %692 = vmatmul.bf16.gmra.mxu0 %v599_v21 }
 0x36a   :  { %v529_v23 = vadd.f32 %v1412_v46, %v528_v22 }
 0x36c   :  { %v572_v25 = vmul.f32 0.01, %v529_v23  ;;  %vm556_vm8 = vcmp.ge.f32.partialorder %v529_v23, 0.0 }
 0x36e   :  { %v588_v28 = vsel %vm556_vm8, %v529_v23, %v572_v25 }
 0x371   :  { %v530_v24 = vpop.f32.mrf.mxu3 }
 0x372   :  { %v531_v26 = vadd.f32 %v1412_v46, %v530_v24 }
 0x374   :  { %v573_v27 = vmul.f32 0.01, %v531_v26  ;;  %vm557_vm9 = vcmp.ge.f32.partialorder %v531_v26, 0.0 }
 0x376   :  { %v589_v29 = vsel %vm557_vm9, %v531_v26, %v573_v27  ;;  %v1196_v27 = vld [vmem:[%s1479_s4 + $0x2] ss:$0 sm:$0xff] }
 0x377   :  { %v600_v30 = vpack.c.bf16 %v589_v29, %v588_v28 }
 0x379   :  { %v533_v31 = vpop.f32.mrf.mxu3  ;;  %697 = vmatmul.bf16.gmra.mxu0 %v600_v30 }
 0x37a   :  { %v534_v32 = vadd.f32 %v1412_v46, %v533_v31 }
 0x37c   :  { %v574_v34 = vmul.f32 0.01, %v534_v32  ;;  %vm558_vm10 = vcmp.ge.f32.partialorder %v534_v32, 0.0 }
 0x37e   :  { %v590_v37 = vsel %vm558_vm10, %v534_v32, %v574_v34 }
 0x381   :  { %v535_v33 = vpop.f32.mrf.mxu3 }
 0x382   :  { %v536_v35 = vadd.f32 %v1412_v46, %v535_v33 }
 0x384   :  { %v575_v36 = vmul.f32 0.01, %v536_v35  ;;  %vm559_vm11 = vcmp.ge.f32.partialorder %v536_v35, 0.0 }
 0x386   :  { %v591_v38 = vsel %vm559_vm11, %v536_v35, %v575_v36 }
 0x387   :  { %v601_v39 = vpack.c.bf16 %v591_v38, %v590_v37 }
 0x389   :  { %v538_v44 = vpop.f32.mrf.mxu3  ;;  %702 = vmatmul.bf16.gmra.mxu0 %v601_v39 }
 0x38a   :  { %v539_v45 = vadd.f32 %v1412_v46, %v538_v44 }
 0x38c   :  { %v576_v52 = vmul.f32 0.01, %v539_v45  ;;  %vm560_vm12 = vcmp.ge.f32.partialorder %v539_v45, 0.0 }
 0x38e   :  { %v592_v55 = vsel %vm560_vm12, %v539_v45, %v576_v52 }
 0x391   :  { %v540_v47 = vpop.f32.mrf.mxu3 }
 0x392   :  { %v541_v53 = vadd.f32 %v1412_v46, %v540_v47 }
 0x394   :  { %v577_v54 = vmul.f32 0.01, %v541_v53  ;;  %vm561_vm13 = vcmp.ge.f32.partialorder %v541_v53, 0.0 }
 0x396   :  { %v593_v56 = vsel %vm561_vm13, %v541_v53, %v577_v54 }
 0x397   :  { %v602_v58 = vpack.c.bf16 %v593_v56, %v592_v55 }
 0x399   :  { %v543_v59 = vpop.f32.mrf.mxu3  ;;  %707 = vmatmul.bf16.gmra.mxu0 %v602_v58 }
 0x39a   :  { %v544_v60 = vadd.f32 %v1412_v46, %v543_v59 }
 0x39c   :  { %v578_v62 = vmul.f32 0.01, %v544_v60  ;;  %vm562_vm14 = vcmp.ge.f32.partialorder %v544_v60, 0.0 }
 0x39e   :  { %v594_v1 = vsel %vm562_vm14, %v544_v60, %v578_v62 }
 0x3a1   :  { %v545_v61 = vpop.f32.mrf.mxu3 }
 0x3a2   :  { %v546_v63 = vadd.f32 %v1412_v46, %v545_v61  ;;  %v1177_v61 = vld [vmem:[%s1477_s3 + $0xf8] sm:$0xff] }
 0x3a3   :  { %873 = vmatpush.bf16.msra.mxu3 %v1177_v61 }
 0x3a4   :  { %vm563_vm15 = vcmp.ge.f32.partialorder %v546_v63, 0.0  ;;  %v579_v0 = vmul.f32 0.01, %v546_v63 }
 0x3a6   :  { %v595_v2 = vsel %vm563_vm15, %v546_v63, %v579_v0  ;;  %v1176_v63 = vld [vmem:[%s1477_s3 + $0xf0] sm:$0xff] }
 0x3a7   :  { %v603_v3 = vpack.c.bf16 %v595_v2, %v594_v1  ;;  %874 = vmatpush.bf16.msra.mxu3 %v1176_v63 }
 0x3a9   :  { %712 = vmatmul.bf16.gmra.mxu0 %v603_v3  ;;  %v1175_v3 = vld [vmem:[%s1477_s3 + $0xe8] sm:$0xff] }
 0x3ab   :  { %875 = vmatpush.bf16.msra.mxu3 %v1175_v3 }
 0x3b6   :  { %v678_v4 = vpop.f32.mrf.mxu0 }
 0x3be   :  { %v680_v5 = vpop.f32.mrf.mxu0 }
 0x3bf   :  { %v718_v6 = vpack.c.bf16 %v680_v5, %v678_v4 }
 0x3c6   :  { %v683_v7 = vpop.f32.mrf.mxu0 }
 0x3ce   :  { %v685_v8 = vpop.f32.mrf.mxu0 }
 0x3cf   :  { %v719_v9 = vpack.c.bf16 %v685_v8, %v683_v7  ;;  %v1174_v7 = vld [vmem:[%s1477_s3 + $0xe0] sm:$0xff] }
 0x3d0   :  { %876 = vmatpush.bf16.msra.mxu3 %v1174_v7 }
 0x3d6   :  { %v688_v10 = vpop.f32.mrf.mxu0 }
 0x3de   :  { %v690_v11 = vpop.f32.mrf.mxu0 }
 0x3df   :  { %v720_v12 = vpack.c.bf16 %v690_v11, %v688_v10  ;;  %v1172_v10 = vld [vmem:[%s1477_s3 + $0xd0] sm:$0xff]  ;;  %v1169_v11 = vld [vmem:[%s1481_s1] sm:$0xff] }
 0x3e6   :  { %v693_v13 = vpop.f32.mrf.mxu0 }
 0x3ee   :  { %v695_v14 = vpop.f32.mrf.mxu0 }
 0x3ef   :  { %v721_v15 = vpack.c.bf16 %v695_v14, %v693_v13  ;;  %v1170_v13 = vld [vmem:[%s1477_s3 + $0xc0] sm:$0xff] }
 0x3f6   :  { %v698_v46 = vpop.f32.mrf.mxu0 }
 0x3fe   :  { %v700_v16 = vpop.f32.mrf.mxu0 }
 0x3ff   :  { %v722_v25 = vpack.c.bf16 %v700_v16, %v698_v46  ;;  %v1197_v16 = vld [vmem:[%s1479_s4 + $0x3] ss:$0 sm:$0xff] }
 0x406   :  { %v703_v17 = vpop.f32.mrf.mxu0 }
 0x40e   :  { %v705_v18 = vpop.f32.mrf.mxu0 }
 0x40f   :  { %v723_v24 = vpack.c.bf16 %v705_v18, %v703_v17 }
 0x416   :  { %v708_v19 = vpop.f32.mrf.mxu0 }
 0x41e   :  { %v710_v20 = vpop.f32.mrf.mxu0 }
 0x41f   :  { %v724_v23 = vpack.c.bf16 %v710_v20, %v708_v19 }
 0x426   :  { %v713_v57 = vpop.f32.mrf.mxu0 }
 0x42e   :  { %v715_v21 = vpop.f32.mrf.mxu0 }
 0x42f   :  { %v725_v22 = vpack.c.bf16 %v715_v21, %v713_v57 }
 0x431   :  { %727 = vmatpush.bf16.msrb.mxu1 %v725_v22 }
 0x435   :  { %728 = vmatpush.bf16.msrb.mxu1 %v724_v23 }
 0x439   :  { %729 = vmatpush.bf16.msrb.mxu1 %v723_v24 }
 0x43d   :  { %730 = vmatpush.bf16.msrb.mxu1 %v722_v25 }
 0x441   :  { %731 = vmatpush.bf16.msrb.mxu1 %v721_v15 }
 0x445   :  { %732 = vmatpush.bf16.msrb.mxu1 %v720_v12  ;;  %v1171_v12 = vld [vmem:[%s1477_s3 + $0xc8] sm:$0xff] }
 0x449   :  { %733 = vmatpush.bf16.msrb.mxu1 %v719_v9  ;;  %v1173_v9 = vld [vmem:[%s1477_s3 + $0xd8] sm:$0xff] }
 0x44a   :  { %877 = vmatpush.bf16.msra.mxu3 %v1173_v9 }
 0x44d   :  { %734 = vmatpush.bf16.msrb.mxu1 %v718_v6 }
 0x44e   :  { %878 = vmatpush.bf16.msra.mxu3 %v1172_v10 }
 0x450   :  { %735 = vmatmul.bf16.vlgmr.msrb.gmra.mxu1 %v1287_v40 }
 0x452   :  { %879 = vmatpush.bf16.msra.mxu3 %v1171_v12 }
 0x456   :  { %880 = vmatpush.bf16.msra.mxu3 %v1170_v13 }
 0x460   :  { %740 = vmatmul.bf16.gmra.mxu1 %v1293_v41 }
 0x470   :  { %745 = vmatmul.bf16.gmra.mxu1 %v1299_v42 }
 0x480   :  { %750 = vmatmul.bf16.gmra.mxu1 %v1323_v48 }
 0x490   :  { %755 = vmatmul.bf16.gmra.mxu1 %v1335_v50 }
 0x4a0   :  { %760 = vmatmul.bf16.gmra.mxu1 %v1304_v43 }
 0x4b0   :  { %765 = vmatmul.bf16.gmra.mxu1 %v1328_v49 }
 0x4c0   :  { %770 = vmatmul.bf16.gmra.mxu1 %v1340_v51 }
 0x4cd   :  { %v736_v26 = vpop.f32.mrf.mxu1 }
 0x4ce   :  { %v737_v28 = vadd.f32 %v1196_v27, %v736_v26 }
 0x4d5   :  { %v738_v40 = vpop.f32.mrf.mxu1 }
 0x4d6   :  { %v739_v41 = vadd.f32 %v1196_v27, %v738_v40 }
 0x4d8   :  { %v778_v29 = vpack.c.bf16 %v739_v41, %v737_v28 }
 0x4dd   :  { %v741_v42 = vpop.f32.mrf.mxu1 }
 0x4de   :  { %v742_v48 = vadd.f32 %v1196_v27, %v741_v42 }
 0x4e5   :  { %v743_v30 = vpop.f32.mrf.mxu1 }
 0x4e6   :  { %v744_v31 = vadd.f32 %v1196_v27, %v743_v30 }
 0x4e8   :  { %v779_v50 = vpack.c.bf16 %v744_v31, %v742_v48 }
 0x4ed   :  { %v746_v32 = vpop.f32.mrf.mxu1 }
 0x4ee   :  { %v747_v33 = vadd.f32 %v1196_v27, %v746_v32 }
 0x4f5   :  { %v748_v43 = vpop.f32.mrf.mxu1 }
 0x4f6   :  { %v749_v49 = vadd.f32 %v1196_v27, %v748_v43 }
 0x4f8   :  { %v780_v34 = vpack.c.bf16 %v749_v49, %v747_v33 }
 0x4fd   :  { %v751_v51 = vpop.f32.mrf.mxu1 }
 0x4fe   :  { %v752_v36 = vadd.f32 %v1196_v27, %v751_v51 }
 0x505   :  { %v753_v35 = vpop.f32.mrf.mxu1 }
 0x506   :  { %v754_v37 = vadd.f32 %v1196_v27, %v753_v35 }
 0x508   :  { %v781_v38 = vpack.c.bf16 %v754_v37, %v752_v36 }
 0x50d   :  { %v756_v39 = vpop.f32.mrf.mxu1 }
 0x50e   :  { %v757_v6 = vadd.f32 %v1196_v27, %v756_v39 }
 0x515   :  { %v758_v44 = vpop.f32.mrf.mxu1 }
 0x516   :  { %v759_v4 = vadd.f32 %v1196_v27, %v758_v44 }
 0x518   :  { %v782_v8 = vpack.c.bf16 %v759_v4, %v757_v6 }
 0x51d   :  { %v761_v45 = vpop.f32.mrf.mxu1 }
 0x51e   :  { %v762_v2 = vadd.f32 %v1196_v27, %v761_v45 }
 0x525   :  { %v763_v47 = vpop.f32.mrf.mxu1 }
 0x526   :  { %v764_v0 = vadd.f32 %v1196_v27, %v763_v47 }
 0x528   :  { %v783_v5 = vpack.c.bf16 %v764_v0, %v762_v2 }
 0x52d   :  { %v766_v52 = vpop.f32.mrf.mxu1 }
 0x52e   :  { %v767_v62 = vadd.f32 %v1196_v27, %v766_v52 }
 0x535   :  { %v768_v53 = vpop.f32.mrf.mxu1 }
 0x536   :  { %v769_v59 = vadd.f32 %v1196_v27, %v768_v53 }
 0x538   :  { %v784_v1 = vpack.c.bf16 %v769_v59, %v767_v62 }
 0x53d   :  { %v771_v54 = vpop.f32.mrf.mxu1 }
 0x53e   :  { %v772_v56 = vadd.f32 %v1196_v27, %v771_v54 }
 0x545   :  { %v773_v55 = vpop.f32.mrf.mxu1 }
 0x546   :  { %v774_v58 = vadd.f32 %v1196_v27, %v773_v55 }
 0x548   :  { %v785_v60 = vpack.c.bf16 %v774_v58, %v772_v56 }
 0x54a   :  { %792 = vmatpush.bf16.msra.mxu2 %v785_v60 }
 0x54e   :  { %793 = vmatpush.bf16.msra.mxu2 %v784_v1 }
 0x552   :  { %794 = vmatpush.bf16.msra.mxu2 %v783_v5 }
 0x556   :  { %795 = vmatpush.bf16.msra.mxu2 %v782_v8 }
 0x55a   :  { %796 = vmatpush.bf16.msra.mxu2 %v781_v38 }
 0x55e   :  { %797 = vmatpush.bf16.msra.mxu2 %v780_v34 }
 0x562   :  { %798 = vmatpush.bf16.msra.mxu2 %v779_v50 }
 0x566   :  { %799 = vmatpush.bf16.msra.mxu2 %v778_v29 }
 0x569   :  { %800 = vmatmul.bf16.vlgmr.msra.gmra.mxu2 %v1169_v11 }
 0x5ec   :  { %v801_v14 = vpop.f32.mrf.mxu2 }
 0x5f4   :  { %v803_v15 = vpop.f32.mrf.mxu2 }
 0x5f5   :  { %v822_v46 = vpack.c.bf16 %v803_v15, %v801_v14 }
 0x5f7   :  { %881 = vmatmul.bf16.vlgmr.msra.gmra.mxu3 %v822_v46 }
 0x67a   :  { %v882_v17 = vpop.f32.mrf.mxu3 }
 0x67b   :  { %v883_v18 = vadd.f32 %v1197_v16, %v882_v17 }
 0x67d   :  { %v1127_v19 = vmul.f32 -1.442695, %v883_v18 }
 0x67f   :  { %1198 = vpow2.f32 %v1127_v19 }
 0x682   :  { %v884_v20 = vpop.f32.mrf.mxu3 }
 0x683   :  { %v885_v57 = vadd.f32 %v1197_v16, %v884_v20 }
 0x685   :  { %v1199_v21 = vpop.eup %1198  ;;  %v1128_v22 = vmul.f32 -1.442695, %v885_v57 }
 0x686   :  { %v893_v23 = vadd.f32 1.0, %v1199_v21 }
 0x687   :  { %1200 = vpow2.f32 %v1128_v22 }
 0x688   :  { %1202 = vrcp.f32 %v893_v23  ;;  %v906_v28 = vand.u32 2147483648, %v893_v23  ;;  %v904_v29 = vand.u32 2147483647, %v893_v23  ;;  %vm900_vm1 = vweird.f32 %v893_v23 }
 0x68a   :  { %v907_v48 = vor.u32 1.1754944e-38, %v906_v28  ;;  %vm905_vm3 = vcmp.eq.f32.partialorder %v904_v29, 8.507059e+37 }
 0x68d   :  { %v1201_v24 = vpop.eup %1200 }
 0x68e   :  { %v1203_v25 = vpop.eup %1202  ;;  %v894_v26 = vadd.f32 1.0, %v1201_v24 }
 0x68f   :  { %v896_v27 = vmul.f32 %v1203_v25, %v893_v23  ;;  %vm901_vm0 = vweird.f32 %v1203_v25 }
 0x690   :  { %1204 = vrcp.f32 %v894_v26  ;;  %vm902_vm2 = vmor %vm900_vm1, %vm901_vm0  ;;  %v921_v33 = vand.u32 2147483648, %v894_v26  ;;  %v919_v34 = vand.u32 2147483647, %v894_v26  ;;  %vm915_vm5 = vweird.f32 %v894_v26 }
 0x691   :  { %v897_v40 = vsub.f32 1.0, %v896_v27 }
 0x692   :  { %v922_v35 = vor.u32 1.1754944e-38, %v921_v33  ;;  %vm920_vm7 = vcmp.eq.f32.partialorder %v919_v34, 8.507059e+37 }
 0x693   :  { %v898_v41 = vmul.f32 %v1203_v25, %v897_v40 }
 0x695   :  { %v899_v42 = vadd.f32 %v1203_v25, %v898_v41 }
 0x696   :  { %v1205_v30 = vpop.eup %1204 }
 0x697   :  { %v903_v31 = vsel %vm902_vm2, %v1203_v25, %v899_v42  ;;  %v911_v50 = vmul.f32 %v1205_v30, %v894_v26  ;;  %vm916_vm4 = vweird.f32 %v1205_v30 }
 0x698   :  { %v908_v32 = vsel %vm905_vm3, %v907_v48, %v903_v31  ;;  %vm917_vm6 = vmor %vm915_vm5, %vm916_vm4 }
 0x699   :  { %925 = vst [vmem:[%s1482_s5] sm:$0xff] %v908_v32  ;;  %v912_v43 = vsub.f32 1.0, %v911_v50 }
 0x69b   :  { %v913_v49 = vmul.f32 %v1205_v30, %v912_v43 }
 0x69d   :  { %v914_v51 = vadd.f32 %v1205_v30, %v913_v49 }
 0x69f   :  { %v918_v36 = vsel %vm917_vm6, %v1205_v30, %v914_v51 }
 0x6a0   :  { %v923_v37 = vsel %vm920_vm7, %v922_v35, %v918_v36 }
 0x6a1   :  { %926 = vst [vmem:[%s1482_s5 + $0x8] sm:$0xff] %v923_v37 }

</bundles_post_ra>
